<compile_context>
chip_gen: v6e
topology: v6e:2x2x1
jax: 0.10.0
libtpu: 0.0.40
codegen_flags: <defaults>
</compile_context>

<pallas_src>
import functools

import jax
import jax.numpy as jnp
from jax import lax
from jax.experimental import pallas as pl
from jax.experimental.pallas import tpu as pltpu

_NEG = -1e30  # finite "-inf": exp(pad - row_max) == 0 exactly, no inf/NaN hazards


def _round_up(x, m):
    return (x + m - 1) // m * m


# --------------------------------------------------------------------------- #
# Kernel A: avg-pool + all 8 linear heads + class-axis softmaxes (cls, ref1-3)
# --------------------------------------------------------------------------- #
def _heads_kernel(x_ref, w_ref, b_ref, main_ref, det_ref, *, sm_widths, bbox_widths):
    # x_ref: (TN, C, HW) — NCHW consumed directly with the spatial axis flattened.
    # AdaptiveAvgPool2d(1) == mean over the trailing axis; the reduce streams the
    # input block and accumulates in f32 (no materialized full-tile f32 copy).
    pooled = jnp.mean(x_ref[...], axis=-1, dtype=jnp.float32)          # (TN, C)

    # One fused MXU matmul for all 8 heads: bf16 operands at native MXU rate,
    # f32 accumulation.  Every head segment is padded to a 128-lane multiple so
    # every store below is lane-aligned (no masked vst).
    logits = jnp.dot(pooled.astype(jnp.bfloat16), w_ref[...],
                     preferred_element_type=jnp.float32) + b_ref[...]

    off = 0
    for w in sm_widths:                     # cls, ref1, ref2, ref3 (static unroll)
        seg = logits[:, off:off + w]
        m = jnp.max(seg, axis=1, keepdims=True)
        e = jnp.exp(seg - m)                # pad cols carry a -1e30 bias -> e == 0
        inv = pl.reciprocal(jnp.sum(e, axis=1, keepdims=True), approx=True)
        main_ref[:, off:off + w] = e * inv
        off += w

    bbox_total = sum(bbox_widths)           # bbox_pred1-3: raw linear outputs
    main_ref[:, off:off + bbox_total] = logits[:, off:off + bbox_total]
    off += bbox_total

    det_ref[...] = logits[:, off:]          # raw det logits -> kernel B


# --------------------------------------------------------------------------- #
# Kernel B: per-image softmax over the proposal (row) axis of the det logits.
# Image boundaries are runtime data in SMEM (no recompile when the proposal
# partitioning changes); masked full-block accumulation keeps every store
# lane/sublane aligned and never lets padded/garbage rows touch real ones.
# --------------------------------------------------------------------------- #
def _det_softmax_kernel(starts_ref, det_ref, out_ref, *, num_images):
    out_ref[...] = jnp.zeros_like(out_ref)

    def body(i, carry):
        lo = starts_ref[i]
        hi = starts_ref[i + 1]
        det = det_ref[...]                                        # (N, Kp) f32
        rows = lax.broadcasted_iota(jnp.int32, det.shape, 0)
        in_seg = (rows >= lo) & (rows < hi)
        m = jnp.max(jnp.where(in_seg, det, _NEG), axis=0, keepdims=True)
        e = jnp.exp(jnp.where(in_seg, det - m, _NEG))             # 0 outside image
        inv = pl.reciprocal(jnp.sum(e, axis=0, keepdims=True), approx=True)
        out_ref[...] += e * inv
        return carry

    lax.fori_loop(0, num_images, body, 0)


# --------------------------------------------------------------------------- #
# Tile / VMEM sizing (per TPU generation)
# --------------------------------------------------------------------------- #
def _pick_tile_and_vmem(N, C, HW, Ktot_pad, main_width, det_width, tile_n=None):
    try:
        vmem_cap = int(getattr(pltpu.get_tpu_info(), "vmem_capacity_bytes",
                               64 * 2 ** 20))
    except Exception:
        vmem_cap = 64 * 2 ** 20                      # conservative default
    if vmem_cap <= 64 * 2 ** 20:                     # v7x-class: 64 MiB, 2 TCs
        budget, max_tn, limit_cap = 40 << 20, 256, 48 << 20
    else:                                            # v5e / v6e: 128 MiB VMEM
        budget, max_tn, limit_cap = 96 << 20, 512, 100 << 20

    C_sub = _round_up(C, 8)        # sublane padding of the f32 x block
    HW_lane = _round_up(HW, 128)   # lane padding of the f32 x block
    C_lane = _round_up(C, 128)     # pooled lives with C on the lane axis
    fixed = (2 * _round_up(C, 16) * Ktot_pad * 2     # bf16 weights (x2 buffers)
             + 2 * 8 * Ktot_pad * 4                  # bias row, sublane-padded
             + (6 << 20))                            # compiler scratch headroom

    def need(tn):
        x_blk = tn * C_sub * HW_lane * 4             # f32 x block incl. padding
        out_blk = tn * (main_width + det_width) * 4  # f32 output blocks
        temps = tn * (C_lane * 6 + 3 * Ktot_pad * 4) # pooled f32+bf16, logits, exps
        return fixed + 2 * (x_blk + out_blk) + temps

    if tile_n is not None:
        tn = _round_up(max(8, int(tile_n)), 8)
    else:
        tn = min(max_tn, _round_up(N, 8))
        while tn > 8 and need(tn) > budget:
            tn = max(8, _round_up(tn // 2, 8))
        # >= 4 grid steps (>= 2 for small N) so the "parallel" axis gives both of
        # v7x's TensorCores work; the ~0.35 us/step extra cost elsewhere is noise.
        if N >= 32:
            tn = min(tn, _round_up(pl.cdiv(N, 4), 8))
        elif N > 8:
            tn = min(tn, _round_up(pl.cdiv(N, 2), 8))
        tn = max(8, tn)

    vmem_limit = int(min(max(need(tn) + (2 << 20), 32 << 20), limit_cap))
    return tn, vmem_limit


# --------------------------------------------------------------------------- #
# Wrapper
# --------------------------------------------------------------------------- #
def mist_predictor_forward(x_nchw, params, proposal_lens,
                           num_classes, num_bbox_reg_classes, tile_n=None):
    """Eval-mode MISTPredictor.forward. Returns (cls, det, [ref1..3], [bbox1..3])."""
    # TODO(synk): training-mode path (raw logits, no softmaxes) not implemented.
    N, C, H, W = x_nchw.shape
    HW = H * W
    K = num_classes
    Bd = num_bbox_reg_classes * 4

    lens = jnp.asarray(proposal_lens, dtype=jnp.int32).reshape(-1)
    num_images = int(lens.shape[0])
    if isinstance(proposal_lens, (list, tuple)):
        assert sum(int(l) for l in proposal_lens) == N
        assert all(int(l) > 0 for l in proposal_lens)
    starts = jnp.concatenate([jnp.zeros((1,), jnp.int32),
                              jnp.cumsum(lens, dtype=jnp.int32)])   # runtime data

    # ---- fused, 128-lane-aligned weight matrix (bf16) -------------------------
    # column order: [cls | ref1 | ref2 | ref3 | bbox1 | bbox2 | bbox3 | det]
    head_order = ["cls_score", "ref1", "ref2", "ref3",
                  "bbox_pred1", "bbox_pred2", "bbox_pred3", "det_score"]
    is_softmax = [True, True, True, True, False, False, False, True]
    w_cols, b_cols, widths = [], [], []
    for name, sm in zip(head_order, is_softmax):
        w = params[name + "_w"].T.astype(jnp.float32)               # (C, out_dim)
        b = params[name + "_b"].astype(jnp.float32)
        out_dim = w.shape[1]
        pad = _round_up(out_dim, 128) - out_dim
        w_cols.append(jnp.pad(w, ((0, 0), (0, pad))))
        b_cols.append(jnp.pad(b, (0, pad), constant_values=_NEG if sm else 0.0))
        widths.append(out_dim + pad)
    w_all = jnp.concatenate(w_cols, axis=1).astype(jnp.bfloat16)    # (C, Ktot_pad)
    b_all = jnp.concatenate(b_cols)[None, :]                        # (1, Ktot_pad) f32
    Ktot_pad = w_all.shape[1]
    Kp, Bp = widths[0], widths[4]
    main_width = 4 * Kp + 3 * Bp
    det_width = widths[7]

    TN, vmem_limit = _pick_tile_and_vmem(N, C, HW, Ktot_pad,
                                         main_width, det_width, tile_n)
    grid_n = max(1, pl.cdiv(N, TN))

    # NCHW consumed directly: (N, C, HW) is a free reshape of the contiguous
    # input — no transpose / cast / pad pre-pass over the dominant tensor.
    x3 = x_nchw.reshape(N, C, HW)

    cost = pl.CostEstimate(
        flops=2 * N * C * Ktot_pad + N * C * HW,
        transcendentals=N * 4 * Kp,
        bytes_accessed=(N * C * HW * x3.dtype.itemsize
                        + w_all.size * 2 + b_all.size * 4
                        + N * (main_width + det_width) * 4))

    kernel_a = functools.partial(_heads_kernel,
                                 sm_widths=(Kp,) * 4, bbox_widths=(Bp,) * 3)
    out_main, det_raw = pl.pallas_call(
        kernel_a,
        grid=(grid_n,),
        in_specs=[
            pl.BlockSpec((TN, C, HW), lambda i: (i, 0, 0)),   # pipelined x blocks
            pl.BlockSpec((C, Ktot_pad), lambda i: (0, 0)),    # VMEM-resident weights
            pl.BlockSpec((1, Ktot_pad), lambda i: (0, 0)),    # VMEM-resident bias
        ],
        out_specs=(
            pl.BlockSpec((TN, main_width), lambda i: (i, 0)),
            pl.BlockSpec((TN, det_width), lambda i: (i, 0)),
        ),
        out_shape=(
            jax.ShapeDtypeStruct((N, main_width), jnp.float32),
            jax.ShapeDtypeStruct((N, det_width), jnp.float32),
        ),
        compiler_params=pltpu.CompilerParams(
            dimension_semantics=("parallel",),
            vmem_limit_bytes=vmem_limit),
        cost_estimate=cost,
    )(x3, w_all, b_all)

    # ---- per-image dim-0 softmax for det (tiny, data-driven boundaries) -------
    kernel_b = functools.partial(_det_softmax_kernel, num_images=num_images)
    det_soft = pl.pallas_call(
        kernel_b,
        out_shape=jax.ShapeDtypeStruct((N, det_width), jnp.float32),
        in_specs=[pl.BlockSpec(memory_space=pltpu.MemorySpace.SMEM),
                  pl.BlockSpec(memory_space=pltpu.MemorySpace.VMEM)],
        out_specs=pl.BlockSpec(memory_space=pltpu.MemorySpace.VMEM),
    )(starts, det_raw)

    # ---- strip lane padding, split heads --------------------------------------
    cls_logit = out_main[:, :K]
    ref_logits = [out_main[:, (1 + i) * Kp:(1 + i) * Kp + K] for i in range(3)]
    b0 = 4 * Kp
    bbox_preds = [out_main[:, b0 + i * Bp: b0 + i * Bp + Bd] for i in range(3)]
    det_logit = det_soft[:, :K]
    return cls_logit, det_logit, ref_logits, bbox_preds


# --------------------------------------------------------------------------- #
# Pure-JAX reference of the PyTorch forward (eval path) + init + test
# --------------------------------------------------------------------------- #
def _reference(x_nchw, params, proposal_lens, num_classes, num_bbox_reg_classes,
               match_kernel_quant=True):
    pooled = x_nchw.astype(jnp.float32).mean(axis=(2, 3))
    if match_kernel_quant:          # kernel stores W in bf16 / feeds the MXU bf16
        pooled = pooled.astype(jnp.bfloat16).astype(jnp.float32)

    def lin(name):
        w = params[name + "_w"]
        if match_kernel_quant:
            w = w.astype(jnp.bfloat16).astype(jnp.float32)
        return pooled @ w.T + params[name + "_b"]

    cls = jax.nn.softmax(lin("cls_score"), axis=1)
    det = lin("det_score")
    pieces, off = [], 0
    for s in proposal_lens:
        pieces.append(jax.nn.softmax(det[off:off + s], axis=0))
        off += s
    det = jnp.concatenate(pieces, axis=0)
    refs = [jax.nn.softmax(lin(f"ref{i}"), axis=1) for i in (1, 2, 3)]
    bboxes = [lin(f"bbox_pred{i}") for i in (1, 2, 3)]
    return cls, det, refs, bboxes


def _init_params(key, in_channels, num_classes, num_bbox_reg_classes):
    # nn.init.normal_(weight, std=0.001); bias = 0 (deterministic via PRNGKey)
    B = num_bbox_reg_classes * 4
    shapes = {
        "cls_score": num_classes, "det_score": num_classes,
        "ref1": num_classes, "ref2": num_classes, "ref3": num_classes,
        "bbox_pred1": B, "bbox_pred2": B, "bbox_pred3": B,
    }
    params = {}
    keys = jax.random.split(key, len(shapes))
    for k, (name, out_dim) in zip(keys, shapes.items()):
        params[name + "_w"] = 0.001 * jax.random.normal(
            k, (out_dim, in_channels), dtype=jnp.float32)    # PyTorch (out, in)
        params[name + "_b"] = jnp.zeros((out_dim,), dtype=jnp.float32)
    return params


if __name__ == "__main__":
    key = jax.random.PRNGKey(0)
    k_x, k_p = jax.random.split(key)

    # Small shapes consistent with the module: N ROI features (N, C, H, W).
    in_channels = 32
    num_classes = 8
    num_bbox_reg_classes = num_classes      # CLS_AGNOSTIC_BBOX_REG = False
    H = W = 4
    proposal_lens = [5, 11]                 # 2 images -> 16 proposals total
    N = sum(proposal_lens)

    x = jax.random.normal(k_x, (N, in_channels, H, W), dtype=jnp.float32)
    params = _init_params(k_p, in_channels, num_classes, num_bbox_reg_classes)

    # Auto tile sizing picks TN=8 here -> a 2-step grid (exercises the pipeline,
    # resident weights across steps, and an image boundary inside a tile).
    cls, det, refs, bboxes = mist_predictor_forward(
        x, params, proposal_lens, num_classes, num_bbox_reg_classes)
    jax.block_until_ready(cls)

    # Reference matches the kernel's declared bf16 weight/activation feed of the
    # MXU (accumulation stays f32).  Softmax heads additionally use the EUP
    # approx reciprocal, so they get a slightly looser tolerance.
    r_cls, r_det, r_refs, r_bboxes = _reference(
        x, params, proposal_lens, num_classes, num_bbox_reg_classes)

    def _sm_ok(a, b):
        return jnp.allclose(a, b, rtol=1e-3, atol=1e-3)

    def _lin_ok(a, b):
        return jnp.allclose(a, b, rtol=1e-4, atol=1e-5)

    assert _sm_ok(cls, r_cls), "cls mismatch"
    assert _sm_ok(det, r_det), "det mismatch"
    for a, b in zip(refs, r_refs):
        assert _sm_ok(a, b), "ref mismatch"
    for a, b in zip(bboxes, r_bboxes):
        assert _lin_ok(a, b), "bbox mismatch"

    print("KERNEL_OK")
</pallas_src>

<mosaic_0001>
module attributes {stable_mosaic.version = 11 : i64} {
  func.func @_heads_kernel(%arg0: i32, %arg1: memref<8x32x16xf32, #tpu.memory_space<vmem>>, %arg2: memref<32x1024xbf16, #tpu.memory_space<vmem>>, %arg3: memref<1x1024xf32, #tpu.memory_space<vmem>>, %arg4: memref<8x896xf32, #tpu.memory_space<vmem>>, %arg5: memref<8x128xf32, #tpu.memory_space<vmem>>) attributes {dimension_semantics = [#tpu.dimension_semantics<parallel>], iteration_bounds = array<i64: 2>, scalar_prefetch = 0 : i64, scratch_operands = 0 : i64, tpu.core_type = #tpu.core_type<tc>, window_params = [{transform_indices = @transform_0, window_bounds = array<i64: 8, 32, 16>}, {pipeline_mode = #tpu.pipeline_mode<synchronous>, transform_indices = @transform_1, window_bounds = array<i64: 32, 1024>}, {pipeline_mode = #tpu.pipeline_mode<synchronous>, transform_indices = @transform_2, window_bounds = array<i64: 1, 1024>}, {transform_indices = @transform_3, window_bounds = array<i64: 8, 896>}, {transform_indices = @transform_4, window_bounds = array<i64: 8, 128>}]} {
    %c0 = arith.constant 0 : index
    %c0_0 = arith.constant 0 : index
    %c0_1 = arith.constant 0 : index
    %0 = vector.load %arg1[%c0, %c0_0, %c0_1] : memref<8x32x16xf32, #tpu.memory_space<vmem>>, vector<8x32x16xf32>
    %cst = arith.constant dense<0.000000e+00> : vector<8x32xf32>
    %1 = vector.multi_reduction <add>, %0, %cst [2] : vector<8x32x16xf32> to vector<8x32xf32>
    %cst_2 = arith.constant 1.600000e+01 : f32
    %2 = vector.broadcast %cst_2 : f32 to vector<8x32xf32>
    %3 = arith.divf %1, %2 : vector<8x32xf32>
    %4 = arith.truncf %3 : vector<8x32xf32> to vector<8x32xbf16>
    %c0_3 = arith.constant 0 : index
    %c0_4 = arith.constant 0 : index
    %5 = vector.load %arg2[%c0_3, %c0_4] : memref<32x1024xbf16, #tpu.memory_space<vmem>>, vector<32x1024xbf16>
    %cst_5 = arith.constant dense<0.000000e+00> : vector<8x1024xf32>
    %6 = tpu.matmul %4, %5, %cst_5 {dimension_numbers = #tpu.dot_dimension_numbers<[1], [0], [0], [1], [0, 0, 1, 1], [], []>} : vector<8x32xbf16>, vector<32x1024xbf16>, vector<8x1024xf32> -> vector<8x1024xf32>
    %c0_6 = arith.constant 0 : index
    %c0_7 = arith.constant 0 : index
    %7 = vector.load %arg3[%c0_6, %c0_7] : memref<1x1024xf32, #tpu.memory_space<vmem>>, vector<1x1024xf32>
    %8 = vector.broadcast %7 : vector<1x1024xf32> to vector<8x1024xf32>
    %9 = arith.addf %6, %8 : vector<8x1024xf32>
    %10 = vector.extract_strided_slice %9 {offsets = [0, 0], sizes = [8, 128], strides = [1, 1]} : vector<8x1024xf32> to vector<8x128xf32>
    %cst_8 = arith.constant dense<0xFF800000> : vector<8xf32>
    %11 = vector.multi_reduction <maximumf>, %10, %cst_8 [1] : vector<8x128xf32> to vector<8xf32>
    %12 = vector.shape_cast %11 : vector<8xf32> to vector<8x1xf32>
    %13 = vector.broadcast %12 : vector<8x1xf32> to vector<8x128xf32>
    %14 = arith.subf %10, %13 : vector<8x128xf32>
    %15 = math.exp %14 : vector<8x128xf32>
    %cst_9 = arith.constant dense<0.000000e+00> : vector<8xf32>
    %16 = vector.multi_reduction <add>, %15, %cst_9 [1] : vector<8x128xf32> to vector<8xf32>
    %17 = vector.shape_cast %16 : vector<8xf32> to vector<8x1xf32>
    %18 = tpu.reciprocal %17 {approx = true} : vector<8x1xf32> -> vector<8x1xf32>
    %19 = vector.broadcast %18 : vector<8x1xf32> to vector<8x128xf32>
    %20 = arith.mulf %15, %19 : vector<8x128xf32>
    %c0_10 = arith.constant 0 : index
    %c0_11 = arith.constant 0 : index
    %21 = vector.load %arg4[%c0_10, %c0_11] : memref<8x896xf32, #tpu.memory_space<vmem>>, vector<8x128xf32>
    tpu.vector_store %arg4[%c0_10, %c0_11], %20 {strides = array<i32>} : memref<8x896xf32, #tpu.memory_space<vmem>>, vector<8x128xf32>,
    %22 = vector.extract_strided_slice %9 {offsets = [0, 128], sizes = [8, 128], strides = [1, 1]} : vector<8x1024xf32> to vector<8x128xf32>
    %cst_12 = arith.constant dense<0xFF800000> : vector<8xf32>
    %23 = vector.multi_reduction <maximumf>, %22, %cst_12 [1] : vector<8x128xf32> to vector<8xf32>
    %24 = vector.shape_cast %23 : vector<8xf32> to vector<8x1xf32>
    %25 = vector.broadcast %24 : vector<8x1xf32> to vector<8x128xf32>
    %26 = arith.subf %22, %25 : vector<8x128xf32>
    %27 = math.exp %26 : vector<8x128xf32>
    %cst_13 = arith.constant dense<0.000000e+00> : vector<8xf32>
    %28 = vector.multi_reduction <add>, %27, %cst_13 [1] : vector<8x128xf32> to vector<8xf32>
    %29 = vector.shape_cast %28 : vector<8xf32> to vector<8x1xf32>
    %30 = tpu.reciprocal %29 {approx = true} : vector<8x1xf32> -> vector<8x1xf32>
    %31 = vector.broadcast %30 : vector<8x1xf32> to vector<8x128xf32>
    %32 = arith.mulf %27, %31 : vector<8x128xf32>
    %c0_14 = arith.constant 0 : index
    %c128 = arith.constant 128 : index
    %33 = vector.load %arg4[%c0_14, %c128] : memref<8x896xf32, #tpu.memory_space<vmem>>, vector<8x128xf32>
    tpu.vector_store %arg4[%c0_14, %c128], %32 {strides = array<i32>} : memref<8x896xf32, #tpu.memory_space<vmem>>, vector<8x128xf32>,
    %34 = vector.extract_strided_slice %9 {offsets = [0, 256], sizes = [8, 128], strides = [1, 1]} : vector<8x1024xf32> to vector<8x128xf32>
    %cst_15 = arith.constant dense<0xFF800000> : vector<8xf32>
    %35 = vector.multi_reduction <maximumf>, %34, %cst_15 [1] : vector<8x128xf32> to vector<8xf32>
    %36 = vector.shape_cast %35 : vector<8xf32> to vector<8x1xf32>
    %37 = vector.broadcast %36 : vector<8x1xf32> to vector<8x128xf32>
    %38 = arith.subf %34, %37 : vector<8x128xf32>
    %39 = math.exp %38 : vector<8x128xf32>
    %cst_16 = arith.constant dense<0.000000e+00> : vector<8xf32>
    %40 = vector.multi_reduction <add>, %39, %cst_16 [1] : vector<8x128xf32> to vector<8xf32>
    %41 = vector.shape_cast %40 : vector<8xf32> to vector<8x1xf32>
    %42 = tpu.reciprocal %41 {approx = true} : vector<8x1xf32> -> vector<8x1xf32>
    %43 = vector.broadcast %42 : vector<8x1xf32> to vector<8x128xf32>
    %44 = arith.mulf %39, %43 : vector<8x128xf32>
    %c0_17 = arith.constant 0 : index
    %c256 = arith.constant 256 : index
    %45 = vector.load %arg4[%c0_17, %c256] : memref<8x896xf32, #tpu.memory_space<vmem>>, vector<8x128xf32>
    tpu.vector_store %arg4[%c0_17, %c256], %44 {strides = array<i32>} : memref<8x896xf32, #tpu.memory_space<vmem>>, vector<8x128xf32>,
    %46 = vector.extract_strided_slice %9 {offsets = [0, 384], sizes = [8, 128], strides = [1, 1]} : vector<8x1024xf32> to vector<8x128xf32>
    %cst_18 = arith.constant dense<0xFF800000> : vector<8xf32>
    %47 = vector.multi_reduction <maximumf>, %46, %cst_18 [1] : vector<8x128xf32> to vector<8xf32>
    %48 = vector.shape_cast %47 : vector<8xf32> to vector<8x1xf32>
    %49 = vector.broadcast %48 : vector<8x1xf32> to vector<8x128xf32>
    %50 = arith.subf %46, %49 : vector<8x128xf32>
    %51 = math.exp %50 : vector<8x128xf32>
    %cst_19 = arith.constant dense<0.000000e+00> : vector<8xf32>
    %52 = vector.multi_reduction <add>, %51, %cst_19 [1] : vector<8x128xf32> to vector<8xf32>
    %53 = vector.shape_cast %52 : vector<8xf32> to vector<8x1xf32>
    %54 = tpu.reciprocal %53 {approx = true} : vector<8x1xf32> -> vector<8x1xf32>
    %55 = vector.broadcast %54 : vector<8x1xf32> to vector<8x128xf32>
    %56 = arith.mulf %51, %55 : vector<8x128xf32>
    %c0_20 = arith.constant 0 : index
    %c384 = arith.constant 384 : index
    %57 = vector.load %arg4[%c0_20, %c384] : memref<8x896xf32, #tpu.memory_space<vmem>>, vector<8x128xf32>
    tpu.vector_store %arg4[%c0_20, %c384], %56 {strides = array<i32>} : memref<8x896xf32, #tpu.memory_space<vmem>>, vector<8x128xf32>,
    %58 = vector.extract_strided_slice %9 {offsets = [0, 512], sizes = [8, 384], strides = [1, 1]} : vector<8x1024xf32> to vector<8x384xf32>
    %c0_21 = arith.constant 0 : index
    %c512 = arith.constant 512 : index
    %59 = vector.load %arg4[%c0_21, %c512] : memref<8x896xf32, #tpu.memory_space<vmem>>, vector<8x384xf32>
    tpu.vector_store %arg4[%c0_21, %c512], %58 {strides = array<i32>} : memref<8x896xf32, #tpu.memory_space<vmem>>, vector<8x384xf32>,
    %60 = vector.extract_strided_slice %9 {offsets = [0, 896], sizes = [8, 128], strides = [1, 1]} : vector<8x1024xf32> to vector<8x128xf32>
    %c0_22 = arith.constant 0 : index
    %c0_23 = arith.constant 0 : index
    %61 = vector.load %arg5[%c0_22, %c0_23] : memref<8x128xf32, #tpu.memory_space<vmem>>, vector<8x128xf32>
    tpu.vector_store %arg5[%c0_22, %c0_23], %60 {strides = array<i32>} : memref<8x128xf32, #tpu.memory_space<vmem>>, vector<8x128xf32>,
    return
  }
  func.func @transform_0(%arg0: i32) -> (i32, i32, i32) {
    %c0_i32 = arith.constant 0 : i32
    %c0_i32_0 = arith.constant 0 : i32
    %c0_i32_1 = arith.constant 0 : i32
    return %arg0, %c0_i32, %c0_i32_0 : i32, i32, i32
  }
  func.func @transform_1(%arg0: i32) -> (i32, i32) {
    %c0_i32 = arith.constant 0 : i32
    %c0_i32_0 = arith.constant 0 : i32
    %c0_i32_1 = arith.constant 0 : i32
    return %c0_i32, %c0_i32_0 : i32, i32
  }
  func.func @transform_2(%arg0: i32) -> (i32, i32) {
    %c0_i32 = arith.constant 0 : i32
    %c0_i32_0 = arith.constant 0 : i32
    %c0_i32_1 = arith.constant 0 : i32
    return %c0_i32, %c0_i32_0 : i32, i32
  }
  func.func @transform_3(%arg0: i32) -> (i32, i32) {
    %c0_i32 = arith.constant 0 : i32
    %c0_i32_0 = arith.constant 0 : i32
    return %arg0, %c0_i32 : i32, i32
  }
  func.func @transform_4(%arg0: i32) -> (i32, i32) {
    %c0_i32 = arith.constant 0 : i32
    %c0_i32_0 = arith.constant 0 : i32
    return %arg0, %c0_i32 : i32, i32
  }
}

</mosaic_0001>

<bundles_post_ra>
// kernel: tpu_custom_call.1
= control target key start
LH: loop header
LB: loop body
LE: loop exit
PB: predicated region body
PF: predicated region fallthrough
CT: control target
= control target key end

     0   :  { %10 = vsyncpa [#allocation3], 0  ;;  %s1659_s0 = inlined_call_operand.vmem [shape: f32[16,32,16], index: 0, kind: input, shape index: {}]   ;;  %s1660_s1 = inlined_call_operand.vmem [shape: bf16[32,1024], index: 1, kind: input, shape index: {}]   ;;  %s1661_s2 = inlined_call_operand.vmem [shape: f32[1,1024], index: 2, kind: input, shape index: {}]   ;;  %s1662_s3 = inlined_call_operand.hbm [shape: f32[16,896], index: 3, kind: output, shape index: {0}]   ;;  %s1663_s4 = inlined_call_operand.hbm [shape: f32[16,128], index: 4, kind: output, shape index: {1}]  }
   0x1   :  { %12 = vsyncpa [#allocation3 + $0x1], 0 }
   0x2   :  { %13 = vsyncpa [#allocation5], 0 }
   0x3   :  { %15 = vsyncpa [#allocation5 + $0x1], 0  ;;  %s1305_s15 = smov 0   ;;  %s1307_s16 = smov 0  }
   0x4   :  { %s1309_s17 = smov 0   ;;  %s1311_s18 = smov 0  }
   0x5 LB: > { %s1326_s19 = sadd.s32 4294967295, %s1275_s18   ;;  %s1088_s20 = sadd.s32 4294967294, %s1275_s18   ;;  %s1275_s18 = sphi %s1311_s18, %s1669_s18   ;;  %s1271_s17 = sphi %s1309_s17, %s1668_s17   ;;  %s1267_s16 = sphi %s1307_s16, %s1667_s16   ;;  %s1263_s15 = sphi %s1305_s15, %s1666_s15  }
   0x6   : > { %s1330_s21 = sadd.s32 1, %s1275_s18   ;;  %s96_s22 = sadd.s32 1, %s1271_s17 }
   0x7   : > { %s93_s23 = ssub.s32 %s1275_s18, %s1330_s21  ;;  %p106_p0 = scmp.ne.s32.totalorder %s1271_s17, %s1267_s16 }
   0x8   : > { %p94_p1 = scmp.eq.s32.totalorder %s93_s23, 0  ;;  %p107_p2 = scmp.eq.s32.totalorder %s1326_s19, 1 }
   0x9   : > { %p112_p3 = scmp.ne.s32.totalorder %s1267_s16, %s1263_s15  ;;  %p113_p4 = scmp.eq.s32.totalorder %s1088_s20, 1 }
   0xa   : > { %s1341_s24 = scalar_select %p94_p1, %s1271_s17, %s96_s22  }
   0xb   : > { %p1343_p5 = por %p107_p2, %p106_p0  ;;  %p1347_p6 = por %p113_p4, %p112_p3 }
   0xc   : > { %p1091_p7 = scmp.ge.s32.totalorder %s1275_s18, 1  ;;  %p173_p8 = scmp.lt.s32.totalorder %s1275_s18, 3 }
   0xe   : > { %p174_p9 = pnand %p1091_p7, %p173_p8 }
   0xf   : > { %s1093_s27 = sshll.u32 (!%p174_p9), %s1326_s19, 3  ;;  %s1586_s6 = sand.u32 (!%p174_p9), 1, %s1267_s16  }
  0x10   : > { %177 = sbr.rel (%p174_p9) target bundleno = 762 (0x2fa), region = 32  ;;  %p206_p10 = scmp.lt.s32.totalorder (!%p174_p9), %s1093_s27, 15 }
  0x11   : > { %s1122_s7 = smul.u32 (!%p174_p9), 56, %s1586_s6  ;;  %s1092_s8 = sshll.u32 (!%p174_p9), %s1586_s6, 3 }
  0x12   : > { %s1599_s10 = scalar_lea.vmem (!%p174_p9), [#allocation4], %s1092_s8  ;;  %s1118_s11 = sshll.u32 (!%p174_p9), %s1326_s19, 7 }
  0x13   : > { %s1594_s9 = scalar_lea.vmem (!%p174_p9), [#allocation2], %s1122_s7  ;;  %s995_s14 = scalar_lea.hbm (!%p174_p9), %s1663_s4, %s1118_s11 }
  0x14   : > { %s997_s20 = sshll.u32 (!%p174_p9), %s1599_s10, 4  ;;  %s970_s22 = scalar_lea.sflag (!%p174_p9), [#allocation5], %s1586_s6  ;;  %s998_s20 = int_to_ptr.vmem [resolvable:$true] %s997_s20 }
  0x15   : > { %s1671_s27 = smov (!%p206_p10, %s1093_s27), 15  ;;  %vm245_vm0 = vcmask 130048   ;;  %vm508_vm1 = vcmask 130112   ;;  %vm515_vm2 = vcmask 195712   ;;  %vm522_vm3 = vcmask 261312   ;;  %s1185_s23 = scalar_lea.vmem %s998_s20, 128 }
  0x16   : > { %s1121_s28 = sshll.u32 %s1671_s27, 5  ;;  %vm657_vm4 = vcmask 1041409   ;;  %vm659_vm5 = vcmask 1042434   ;;  %vm661_vm6 = vcmask 1043459   ;;  %vm663_vm7 = vcmask 1044484   ;;  %p1186_p11 = scmp.ne.s32.totalorder %s998_s20, %s1185_s23 }
  0x17   : > { %s1357_s5 = scalar_lea.vmem %s1659_s0, %s1121_s28  ;;  %vm665_vm8 = vcmask 1045509   ;;  %vm667_vm9 = vcmask 1046534   ;;  %vm669_vm10 = vcmask 1047559   ;;  %vm752_vm11 = vcmask 261120   ;;  %s1278_s27 = smov [#allocation4]  }
  0x18   : > { %v217_v0 = vld [vmem:[%s1357_s5 + $0x20] sm:$0xff]  ;;  %v218_v2 = vld [vmem:[%s1357_s5 + $0x28] sm:$0xff]  ;;  %v216_v8 = vld [vmem:[%s1357_s5 + $0x18] sm:$0xff]  ;;  %p1187_p12 = pnand %p1186_p11, %p1343_p5  ;;  %s1189_s28 = sshll.u32 %s1278_s27, 4  ;;  %s1190_s28 = int_to_ptr.vmem [resolvable:$false] %s1189_s28 }
  0x19   : > { %v213_v1 = vld [vmem:[%s1357_s5] sm:$0xff]  ;;  %v258_v3 = vsel %vm245_vm0, %v217_v0, 0.0  ;;  %v214_v5 = vld [vmem:[%s1357_s5 + $0x8] sm:$0xff]  ;;  %v261_v6 = vsel %vm245_vm0, %v218_v2, 0.0  ;;  %v215_v9 = vld [vmem:[%s1357_s5 + $0x10] sm:$0xff]  ;;  %v255_v10 = vsel %vm245_vm0, %v216_v8, 0.0  ;;  %p1192_p0 = scmp.lt.s32.totalorder %s998_s20, %s1190_s28 }
  0x1a   : > { %v246_v4 = vsel %vm245_vm0, %v213_v1, 0.0  ;;  %259 = vadd.xlane.f32.xlu1 %v258_v3  ;;  %v249_v7 = vsel %vm245_vm0, %v214_v5, 0.0  ;;  %v252_v11 = vsel %vm245_vm0, %v215_v9, 0.0  ;;  %v220_v12 = vld [vmem:[%s1357_s5 + $0x38] sm:$0xff]  ;;  %v219_v13 = vld [vmem:[%s1357_s5 + $0x30] sm:$0xff]  ;;  %v222_v16 = vld [vmem:[%s1357_s5 + $0x48] sm:$0xff]  ;;  %p1188_p13 = pneg %p1187_p12 }
  0x1b   : > { %247 = vadd.xlane.f32.xlu0 %v246_v4  ;;  %v267_v14 = vsel %vm245_vm0, %v220_v12, 0.0  ;;  %v264_v15 = vsel %vm245_vm0, %v219_v13, 0.0  ;;  %v221_v17 = vld [vmem:[%s1357_s5 + $0x40] sm:$0xff]  ;;  %v273_v18 = vsel %vm245_vm0, %v222_v16, 0.0  ;;  %v224_v20 = vld [vmem:[%s1357_s5 + $0x58] sm:$0xff]  ;;  %v223_v21 = vld [vmem:[%s1357_s5 + $0x50] sm:$0xff] }
  0x1c   : > { %v270_v19 = vsel %vm245_vm0, %v221_v17, 0.0  ;;  %v279_v22 = vsel %vm245_vm0, %v224_v20, 0.0  ;;  %v276_v23 = vsel %vm245_vm0, %v223_v21, 0.0  ;;  %v226_v24 = vld [vmem:[%s1357_s5 + $0x68] sm:$0xff]  ;;  %v225_v25 = vld [vmem:[%s1357_s5 + $0x60] sm:$0xff]  ;;  %v228_v28 = vld [vmem:[%s1357_s5 + $0x78] sm:$0xff] }
  0x1d   : > { %v285_v26 = vsel %vm245_vm0, %v226_v24, 0.0  ;;  %v282_v27 = vsel %vm245_vm0, %v225_v25, 0.0  ;;  %v227_v29 = vld [vmem:[%s1357_s5 + $0x70] sm:$0xff]  ;;  %v291_v30 = vsel %vm245_vm0, %v228_v28, 0.0  ;;  %v230_v32 = vld [vmem:[%s1357_s5 + $0x88] sm:$0xff]  ;;  %v229_v33 = vld [vmem:[%s1357_s5 + $0x80] sm:$0xff] }
  0x1e   : > { %262 = vadd.xlane.f32.xlu1 %v261_v6  ;;  %v288_v31 = vsel %vm245_vm0, %v227_v29, 0.0  ;;  %v297_v34 = vsel %vm245_vm0, %v230_v32, 0.0  ;;  %v294_v35 = vsel %vm245_vm0, %v229_v33, 0.0  ;;  %v232_v36 = vld [vmem:[%s1357_s5 + $0x98] sm:$0xff]  ;;  %v231_v37 = vld [vmem:[%s1357_s5 + $0x90] sm:$0xff]  ;;  %v234_v40 = vld [vmem:[%s1357_s5 + $0xa8] sm:$0xff] }
  0x1f   : > { %250 = vadd.xlane.f32.xlu0 %v249_v7  ;;  %v303_v38 = vsel %vm245_vm0, %v232_v36, 0.0  ;;  %v300_v39 = vsel %vm245_vm0, %v231_v37, 0.0  ;;  %v233_v41 = vld [vmem:[%s1357_s5 + $0xa0] sm:$0xff]  ;;  %v309_v42 = vsel %vm245_vm0, %v234_v40, 0.0  ;;  %v236_v44 = vld [vmem:[%s1357_s5 + $0xb8] sm:$0xff]  ;;  %v235_v45 = vld [vmem:[%s1357_s5 + $0xb0] sm:$0xff] }
  0x20   : > { %v306_v43 = vsel %vm245_vm0, %v233_v41, 0.0  ;;  %v315_v46 = vsel %vm245_vm0, %v236_v44, 0.0  ;;  %v312_v47 = vsel %vm245_vm0, %v235_v45, 0.0  ;;  %v238_v48 = vld [vmem:[%s1357_s5 + $0xc8] sm:$0xff]  ;;  %v237_v49 = vld [vmem:[%s1357_s5 + $0xc0] sm:$0xff]  ;;  %v240_v52 = vld [vmem:[%s1357_s5 + $0xd8] sm:$0xff] }
  0x21   : > { %v321_v50 = vsel %vm245_vm0, %v238_v48, 0.0  ;;  %v318_v51 = vsel %vm245_vm0, %v237_v49, 0.0  ;;  %v239_v53 = vld [vmem:[%s1357_s5 + $0xd0] sm:$0xff]  ;;  %v327_v54 = vsel %vm245_vm0, %v240_v52, 0.0  ;;  %v242_v56 = vld [vmem:[%s1357_s5 + $0xe8] sm:$0xff]  ;;  %v241_v57 = vld [vmem:[%s1357_s5 + $0xe0] sm:$0xff] }
  0x22   : > { %256 = vadd.xlane.f32.xlu1 %v255_v10  ;;  %v324_v55 = vsel %vm245_vm0, %v239_v53, 0.0  ;;  %v333_v58 = vsel %vm245_vm0, %v242_v56, 0.0  ;;  %v330_v59 = vsel %vm245_vm0, %v241_v57, 0.0  ;;  %v244_v60 = vld [vmem:[%s1357_s5 + $0xf8] sm:$0xff]  ;;  %v243_v61 = vld [vmem:[%s1357_s5 + $0xf0] sm:$0xff]  ;;  %v399_v0 = vld [vmem:[%s1660_s1 + $0x40] sm:$0xff] }
  0x23   : > { %253 = vadd.xlane.f32.xlu0 %v252_v11  ;;  %v339_v62 = vsel %vm245_vm0, %v244_v60, 0.0  ;;  %v336_v63 = vsel %vm245_vm0, %v243_v61, 0.0  ;;  %v403_v1 = vld [vmem:[%s1660_s1 + $0x60] sm:$0xff]  ;;  %v400_v2 = vld [vmem:[%s1660_s1 + $0x48] sm:$0xff]  ;;  %v1277_v16 = vmov 0   ;;  %v1452_v17 = vld [vmem:[%s1660_s1 + $0x50] sm:$0xff] }
  0x24   : > { %v1105_v3 = vcombine.high %v399_v0, %v403_v1  ;;  %v404_v4 = vld [vmem:[%s1660_s1 + $0x68] sm:$0xff]  ;;  %v1104_v6 = vcombine.low %v399_v0, %v403_v1  ;;  %v391_v8 = vld [vmem:[%s1660_s1] sm:$0xff]  ;;  %788 = vmatprep.mubr.bf16.mxu0 %v1277_v16  ;;  %829 = vmatprep.mubr.bf16.mxu1 %v1277_v16  ;;  %v1469_v21 = vld [vmem:[%s1660_s1 + $0x78] sm:$0xff]  ;;  %s1191_s29 = scalar_lea.vmem %s1190_s28, 256 }
  0x25   : > { %v1107_v5 = vcombine.high %v400_v2, %v404_v4  ;;  %v1106_v7 = vcombine.low %v400_v2, %v404_v4  ;;  %v395_v9 = vld [vmem:[%s1660_s1 + $0x20] sm:$0xff]  ;;  %v392_v10 = vld [vmem:[%s1660_s1 + $0x8] sm:$0xff]  ;;  %p1193_p1 = scmp.lt.s32.totalorder %s1191_s29, %s1185_s23 }
  0x26   : > { %268 = vadd.xlane.f32.xlu1 %v267_v14  ;;  %768 = vmatprep.subr.bf16.mxu0 %v1105_v3  ;;  %v1097_v11 = vcombine.high %v391_v8, %v395_v9  ;;  %v396_v12 = vld [vmem:[%s1660_s1 + $0x28] sm:$0xff]  ;;  %v1096_v13 = vcombine.low %v391_v8, %v395_v9 }
  0x27   : > { %265 = vadd.xlane.f32.xlu0 %v264_v15  ;;  %809 = vmatprep.subr.bf16.mxu1 %v1107_v5  ;;  %v1099_v14 = vcombine.high %v392_v10, %v396_v12  ;;  %v1098_v15 = vcombine.low %v392_v10, %v396_v12  ;;  %p1194_p2 = por %p1193_p1, %p1192_p0 }
  0x28   : > { %769 = vmatpush1.bf16.msra.mxu0 %v1104_v6  ;;  %810 = vmatpush1.bf16.msra.mxu1 %v1106_v7 }
  0x29   : > { %770 = vmatprep.subr.bf16.mxu0 %v1097_v11  ;;  %811 = vmatprep.subr.bf16.mxu1 %v1099_v14  ;;  %p1195_p3 = pnand %p1194_p2, %p1188_p13 }
  0x2a   : > { %274 = vadd.xlane.f32.xlu1 %v273_v18  ;;  %v1457_v18 = vld [vmem:[%s1660_s1 + $0x70] sm:$0xff] }
  0x2b   : > { %271 = vadd.xlane.f32.xlu0 %v270_v19  ;;  %v1462_v19 = vld [vmem:[%s1660_s1 + $0x58] sm:$0xff]  ;;  %v1109_v20 = vcombine.high %v1452_v17, %v1457_v18 }
  0x2c   : > { %771 = vmatpush1.bf16.msra.mxu0 %v1096_v13  ;;  %812 = vmatpush1.bf16.msra.mxu1 %v1098_v15  ;;  %v1111_v24 = vcombine.high %v1462_v19, %v1469_v21 }
  0x2d   : > { %850 = vmatprep.subr.bf16.mxu0 %v1109_v20 }
  0x2e   : > { %280 = vadd.xlane.f32.xlu1 %v279_v22  ;;  %v1108_v22 = vcombine.low %v1452_v17, %v1457_v18  ;;  %891 = vmatprep.subr.bf16.mxu1 %v1111_v24  ;;  %v407_v18 = vld [vmem:[%s1661_s2] sm:$0xff] }
  0x2f   : > { %277 = vadd.xlane.f32.xlu0 %v276_v23  ;;  %v1110_v23 = vcombine.low %v1462_v19, %v1469_v21 }
  0x32   : > { %286 = vadd.xlane.f32.xlu1 %v285_v26 }
  0x33   : > { %283 = vadd.xlane.f32.xlu0 %v282_v27 }
  0x36   : > { %292 = vadd.xlane.f32.xlu1 %v291_v30 }
  0x37   : > { %289 = vadd.xlane.f32.xlu0 %v288_v31 }
  0x3a   : > { %298 = vadd.xlane.f32.xlu1 %v297_v34 }
  0x3b   : > { %295 = vadd.xlane.f32.xlu0 %v294_v35  ;;  %v409_v35 = vlaneseq }
  0x3d   : > { %v1477_v45 = vshrl.u32 %v409_v35, 7 }
  0x3e   : > { %304 = vadd.xlane.f32.xlu1 %v303_v38  ;;  %v498_v38 = vand.u32 127, %v409_v35 }
  0x3f   : > { %301 = vadd.xlane.f32.xlu0 %v300_v39  ;;  %v411_v17 = vsub.s32 0, %v1477_v45  ;;  %v415_v19 = vsub.s32 1, %v1477_v45 }
  0x40   : > { %v1480_v57 = vsub.s32 %v498_v38, %v1477_v45  ;;  %v517_v60 = vadd.s32 4294967272, %v498_v38 }
  0x41   : > { %v412_v21 = vrot.slane %v407_v18, %v411_v17 }
  0x42   : > { %310 = vadd.xlane.f32.xlu1 %v309_v42  ;;  %v1489_v9 = vsub.s32 %v517_v60, %v1477_v45 }
  0x43   : > { %307 = vadd.xlane.f32.xlu0 %v306_v43 }
  0x46   : > { %316 = vadd.xlane.f32.xlu1 %v315_v46  ;;  %v503_v46 = vadd.s32 4294967288, %v498_v38 }
  0x47   : > { %313 = vadd.xlane.f32.xlu0 %v312_v47 }
  0x4a   : > { %322 = vadd.xlane.f32.xlu1 %v321_v50 }
  0x4b   : > { %319 = vadd.xlane.f32.xlu0 %v318_v51 }
  0x4e   : > { %328 = vadd.xlane.f32.xlu1 %v327_v54 }
  0x4f   : > { %325 = vadd.xlane.f32.xlu0 %v324_v55 }
  0x52   : > { %334 = vadd.xlane.f32.xlu1 %v333_v58  ;;  %v1483_v58 = vsub.s32 %v503_v46, %v1477_v45 }
  0x53   : > { %331 = vadd.xlane.f32.xlu0 %v330_v59  ;;  %v510_v59 = vadd.s32 4294967280, %v498_v38 }
  0x55   : > { %v1486_v8 = vsub.s32 %v510_v59, %v1477_v45 }
  0x56   : > { %340 = vadd.xlane.f32.xlu1 %v339_v62 }
  0x57   : > { %337 = vadd.xlane.f32.xlu0 %v336_v63 }
  0xa3   : > { %v260_v25 = vpop.xlane.xlu1 %259 }
  0xa4   : > { %v248_v26 = vpop.xlane.xlu0 %247  ;;  %v347_v43 = vmul.f32 0.0625, %v260_v25 }
  0xa5   : > { %v343_v44 = vmul.f32 0.0625, %v248_v26 }
  0xa7   : > { %v263_v27 = vpop.xlane.xlu1 %262 }
  0xa8   : > { %v251_v28 = vpop.xlane.xlu0 %250  ;;  %v348_v41 = vmul.f32 0.0625, %v263_v27 }
  0xa9   : > { %v344_v42 = vmul.f32 0.0625, %v251_v28 }
  0xaa   : > { %v377_v49 = vpack.c.bf16 %v348_v41, %v347_v43 }
  0xab   : > { %v257_v29 = vpop.xlane.xlu1 %256  ;;  %v375_v50 = vpack.c.bf16 %v344_v42, %v343_v44 }
  0xac   : > { %v254_v30 = vpop.xlane.xlu0 %253  ;;  %v346_v51 = vmul.f32 0.0625, %v257_v29  ;;  %v469_v63 = vunpack.c.l.b16 %v377_v49  ;;  %v470_v0 = vunpack.c.h.b16 %v377_v49 }
  0xad   : > { %v345_v52 = vmul.f32 0.0625, %v254_v30  ;;  %v465_v1 = vunpack.c.l.b16 %v375_v50  ;;  %v466_v2 = vunpack.c.h.b16 %v375_v50 }
  0xae   : > { %v527_v12 = vrot.slane %v469_v63, %v1480_v57  ;;  %v531_v13 = vrot.slane %v470_v0, %v1483_v58 }
  0xaf   : > { %v269_v31 = vpop.xlane.xlu1 %268  ;;  %v376_v3 = vpack.c.bf16 %v346_v51, %v345_v52  ;;  %v502_v14 = vrot.slane %v465_v1, %v1480_v57  ;;  %v507_v15 = vrot.slane %v466_v2, %v1483_v58 }
  0xb0   : > { %v266_v32 = vpop.xlane.xlu0 %265  ;;  %v350_v53 = vmul.f32 0.0625, %v269_v31 }
  0xb1   : > { %v349_v54 = vmul.f32 0.0625, %v266_v32  ;;  %v467_v20 = vunpack.c.l.b16 %v376_v3  ;;  %v468_v24 = vunpack.c.h.b16 %v376_v3  ;;  %v532_v32 = vsel %vm508_vm1, %v531_v13, %v527_v12 }
  0xb3   : > { %v275_v33 = vpop.xlane.xlu1 %274  ;;  %v378_v4 = vpack.c.bf16 %v350_v53, %v349_v54  ;;  %v514_v35 = vrot.slane %v467_v20, %v1486_v8 }
  0xb4   : > { %v272_v34 = vpop.xlane.xlu0 %271  ;;  %v352_v55 = vmul.f32 0.0625, %v275_v33 }
  0xb5   : > { %v351_v56 = vmul.f32 0.0625, %v272_v34  ;;  %v471_v27 = vunpack.c.l.b16 %v378_v4  ;;  %v509_v34 = vsel %vm508_vm1, %v507_v15, %v502_v14  ;;  %v472_v38 = vunpack.c.h.b16 %v378_v4 }
  0xb6   : > { %v516_v63 = vsel %vm515_vm2, %v514_v35, %v509_v34 }
  0xb7   : > { %v281_v36 = vpop.xlane.xlu1 %280  ;;  %v379_v5 = vpack.c.bf16 %v352_v55, %v351_v56 }
  0xb8   : > { %v278_v37 = vpop.xlane.xlu0 %277  ;;  %v354_v6 = vmul.f32 0.0625, %v281_v36  ;;  %v521_v36 = vrot.slane %v468_v24, %v1489_v9 }
  0xb9   : > { %v353_v7 = vmul.f32 0.0625, %v278_v37  ;;  %v473_v28 = vunpack.c.l.b16 %v379_v5  ;;  %v474_v33 = vunpack.c.h.b16 %v379_v5 }
  0xba   : > { %v1511_v15 = vsel %vm522_vm3, %v521_v36, %v516_v63 }
  0xbb   : > { %v287_v39 = vpop.xlane.xlu1 %286  ;;  %v380_v29 = vpack.c.bf16 %v354_v6, %v353_v7  ;;  %v550_v51 = vrot.slane %v474_v33, %v1483_v58 }
  0xbc   : > { %v284_v40 = vpop.xlane.xlu0 %283  ;;  %v356_v25 = vmul.f32 0.0625, %v287_v39  ;;  %v536_v39 = vrot.slane %v471_v27, %v1486_v8 }
  0xbd   : > { %v355_v26 = vmul.f32 0.0625, %v284_v40  ;;  %v546_v40 = vrot.slane %v473_v28, %v1480_v57  ;;  %v475_v41 = vunpack.c.l.b16 %v380_v29  ;;  %v476_v52 = vunpack.c.h.b16 %v380_v29 }
  0xbf   : > { %v293_v47 = vpop.xlane.xlu1 %292  ;;  %v381_v37 = vpack.c.bf16 %v356_v25, %v355_v26  ;;  %v555_v0 = vrot.slane %v475_v41, %v1486_v8  ;;  %v551_v5 = vsel %vm508_vm1, %v550_v51, %v546_v40 }
  0xc0   : > { %v290_v48 = vpop.xlane.xlu0 %289  ;;  %v358_v42 = vmul.f32 0.0625, %v293_v47 }
  0xc1   : > { %v357_v43 = vmul.f32 0.0625, %v290_v48  ;;  %v477_v55 = vunpack.c.l.b16 %v381_v37  ;;  %v478_v56 = vunpack.c.h.b16 %v381_v37  ;;  %v537_v48 = vsel %vm515_vm2, %v536_v39, %v532_v32 }
  0xc2   : > { %v556_v20 = vsel %vm515_vm2, %v555_v0, %v551_v5 }
  0xc3   : > { %v299_v61 = vpop.xlane.xlu1 %298  ;;  %v565_v12 = vrot.slane %v477_v55, %v1480_v57  ;;  %v569_v13 = vrot.slane %v478_v56, %v1483_v58 }
  0xc4   : > { %v296_v62 = vpop.xlane.xlu0 %295  ;;  %v360_v44 = vmul.f32 0.0625, %v299_v61  ;;  %v541_v61 = vrot.slane %v472_v38, %v1489_v9 }
  0xc5   : > { %v359_v46 = vmul.f32 0.0625, %v296_v62  ;;  %v382_v62 = vpack.c.bf16 %v358_v42, %v357_v43  ;;  %v570_v36 = vsel %vm508_vm1, %v569_v13, %v565_v12 }
  0xc6   : > { %v542_v32 = vsel %vm522_vm3, %v541_v61, %v537_v48 }
  0xc7   : > { %v305_v10 = vpop.xlane.xlu1 %304  ;;  %v383_v2 = vpack.c.bf16 %v360_v44, %v359_v46  ;;  %v479_v26 = vunpack.c.l.b16 %v382_v62  ;;  %v480_v27 = vunpack.c.h.b16 %v382_v62 }
  0xc8   : > { %v302_v11 = vpop.xlane.xlu0 %301  ;;  %v362_v53 = vmul.f32 0.0625, %v305_v10 }
  0xc9   : > { %v361_v54 = vmul.f32 0.0625, %v302_v11  ;;  %v560_v11 = vrot.slane %v476_v52, %v1489_v9  ;;  %v481_v28 = vunpack.c.l.b16 %v383_v2  ;;  %v482_v29 = vunpack.c.h.b16 %v383_v2 }
  0xca   : > { %v574_v44 = vrot.slane %v479_v26, %v1486_v8  ;;  %v579_v46 = vrot.slane %v480_v27, %v1489_v9 }
  0xcb   : > { %v311_v30 = vpop.xlane.xlu1 %310  ;;  %v384_v6 = vpack.c.bf16 %v362_v53, %v361_v54  ;;  %v561_v37 = vsel %vm522_vm3, %v560_v11, %v556_v20 }
  0xcc   : > { %v308_v31 = vpop.xlane.xlu0 %307  ;;  %v364_v59 = vmul.f32 0.0625, %v311_v30  ;;  %v575_v62 = vsel %vm515_vm2, %v574_v44, %v570_v36 }
  0xcd   : > { %v363_v60 = vmul.f32 0.0625, %v308_v31  ;;  %v483_v33 = vunpack.c.l.b16 %v384_v6  ;;  %v484_v53 = vunpack.c.h.b16 %v384_v6 }
  0xcf   : > { %v317_v49 = vpop.xlane.xlu1 %316  ;;  %v385_v14 = vpack.c.bf16 %v364_v59, %v363_v60  ;;  %v593_v54 = vrot.slane %v483_v33, %v1486_v8 }
  0xd0   : > { %v314_v50 = vpop.xlane.xlu0 %313  ;;  %v366_v1 = vmul.f32 0.0625, %v317_v49  ;;  %v584_v49 = vrot.slane %v481_v28, %v1480_v57 }
  0xd1   : > { %v365_v47 = vmul.f32 0.0625, %v314_v50  ;;  %v485_v38 = vunpack.c.l.b16 %v385_v14  ;;  %v486_v39 = vunpack.c.h.b16 %v385_v14  ;;  %v588_v50 = vrot.slane %v482_v29, %v1483_v58 }
  0xd2   : > { %v580_v29 = vsel %vm522_vm3, %v579_v46, %v575_v62  ;;  %v397_v46 = vld [vmem:[%s1660_s1 + $0x30] sm:$0xff] }
  0xd3   : > { %v323_v3 = vpop.xlane.xlu1 %322  ;;  %v386_v24 = vpack.c.bf16 %v366_v1, %v365_v47  ;;  %v603_v59 = vrot.slane %v485_v38, %v1480_v57  ;;  %v607_v60 = vrot.slane %v486_v39, %v1483_v58  ;;  %v589_v2 = vsel %vm508_vm1, %v588_v50, %v584_v49 }
  0xd4   : > { %v320_v4 = vpop.xlane.xlu0 %319  ;;  %v368_v7 = vmul.f32 0.0625, %v323_v3 }
  0xd5   : > { %v367_v10 = vmul.f32 0.0625, %v320_v4  ;;  %v487_v40 = vunpack.c.l.b16 %v386_v24  ;;  %v488_v63 = vunpack.c.h.b16 %v386_v24  ;;  %v608_v13 = vsel %vm508_vm1, %v607_v60, %v603_v59 }
  0xd7   : > { %v387_v25 = vpack.c.bf16 %v368_v7, %v367_v10  ;;  %v329_v30 = vpop.xlane.xlu1 %328  ;;  %v612_v1 = vrot.slane %v487_v40, %v1486_v8  ;;  %v594_v7 = vsel %vm515_vm2, %v593_v54, %v589_v2  ;;  %v598_v10 = vrot.slane %v484_v53, %v1489_v9 }
  0xd8   : > { %v326_v31 = vpop.xlane.xlu0 %325  ;;  %v370_v34 = vmul.f32 0.0625, %v329_v30  ;;  %v617_v14 = vrot.slane %v488_v63, %v1489_v9 }
  0xd9   : > { %v369_v35 = vmul.f32 0.0625, %v326_v31  ;;  %v489_v41 = vunpack.c.l.b16 %v387_v25  ;;  %v490_v42 = vunpack.c.h.b16 %v387_v25  ;;  %v613_v25 = vsel %vm515_vm2, %v612_v1, %v608_v13 }
  0xda   : > { %v618_v40 = vsel %vm522_vm3, %v617_v14, %v613_v25  ;;  %v427_v1 = vsub.s32 4, %v1477_v45 }
  0xdb   : > { %v388_v43 = vpack.c.bf16 %v370_v34, %v369_v35  ;;  %v335_v51 = vpop.xlane.xlu1 %334  ;;  %v622_v47 = vrot.slane %v489_v41, %v1480_v57  ;;  %v626_v48 = vrot.slane %v490_v42, %v1483_v58  ;;  %v658_v34 = vsel %vm657_vm4, %v542_v32, %v1511_v15 }
  0xdc   : > { %v332_v52 = vpop.xlane.xlu0 %331  ;;  %v372_v56 = vmul.f32 0.0625, %v335_v51  ;;  %v599_v35 = vsel %vm522_vm3, %v598_v10, %v594_v7  ;;  %v660_v39 = vsel %vm659_vm5, %v561_v37, %v658_v34  ;;  %v393_v37 = vld [vmem:[%s1660_s1 + $0x10] sm:$0xff]  ;;  %v428_v10 = vrot.slane %v407_v18, %v427_v1 }
  0xdd   : > { %v491_v55 = vunpack.c.l.b16 %v388_v43  ;;  %v371_v0 = vmul.f32 0.0625, %v332_v52  ;;  %v492_v61 = vunpack.c.h.b16 %v388_v43  ;;  %v627_v26 = vsel %vm508_vm1, %v626_v48, %v622_v47 }
  0xde   : > { %v662_v41 = vsel %vm661_vm6, %v580_v29, %v660_v39  ;;  %v1101_v53 = vcombine.high %v393_v37, %v397_v46  ;;  %v435_v47 = vsub.s32 6, %v1477_v45 }
  0xdf   : > { %v631_v3 = vrot.slane %v491_v55, %v1486_v8  ;;  %v389_v4 = vpack.c.bf16 %v372_v56, %v371_v0  ;;  %v341_v5 = vpop.xlane.xlu1 %340  ;;  %v636_v27 = vrot.slane %v492_v61, %v1489_v9  ;;  %v664_v15 = vsel %vm663_vm7, %v599_v35, %v662_v41 }
  0xe0   : > { %v338_v6 = vpop.xlane.xlu0 %337  ;;  %v374_v11 = vmul.f32 0.0625, %v341_v5  ;;  %v666_v44 = vsel %vm665_vm8, %v618_v40, %v664_v15  ;;  %v1100_v55 = vcombine.low %v393_v37, %v397_v46 }
  0xe1   : > { %v373_v12 = vmul.f32 0.0625, %v338_v6  ;;  %v493_v20 = vunpack.c.l.b16 %v389_v4  ;;  %v494_v24 = vunpack.c.h.b16 %v389_v4  ;;  %v632_v30 = vsel %vm515_vm2, %v631_v3, %v627_v26 }
  0xe2   : > { %v637_v42 = vsel %vm522_vm3, %v636_v27, %v632_v30  ;;  %v431_v3 = vsub.s32 5, %v1477_v45  ;;  %v439_v4 = vsub.s32 7, %v1477_v45 }
  0xe3   : > { %v390_v28 = vpack.c.bf16 %v374_v11, %v373_v12  ;;  %v641_v31 = vrot.slane %v493_v20, %v1480_v57  ;;  %v645_v33 = vrot.slane %v494_v24, %v1483_v58  ;;  %v668_v50 = vsel %vm667_vm9, %v637_v42, %v666_v44 }
  0xe4   : > { %v436_v11 = vrot.slane %v407_v18, %v435_v47  ;;  %v432_v20 = vrot.slane %v407_v18, %v431_v3  ;;  %v440_v24 = vrot.slane %v407_v18, %v439_v4 }
  0xe5   : > { %v495_v36 = vunpack.c.l.b16 %v390_v28  ;;  %v496_v38 = vunpack.c.h.b16 %v390_v28  ;;  %v646_v32 = vsel %vm508_vm1, %v645_v33, %v641_v31 }
  0xe7   : > { %v650_v57 = vrot.slane %v495_v36, %v1486_v8  ;;  %v655_v58 = vrot.slane %v496_v38, %v1489_v9  ;;  %v394_v8 = vld [vmem:[%s1660_s1 + $0x18] sm:$0xff] }
  0xe8   : > { %v398_v9 = vld [vmem:[%s1660_s1 + $0x38] sm:$0xff] }
  0xe9   : > { %v651_v43 = vsel %vm515_vm2, %v650_v57, %v646_v32  ;;  %v1103_v54 = vcombine.high %v394_v8, %v398_v9  ;;  %v1102_v56 = vcombine.low %v394_v8, %v398_v9 }
  0xea   : > { %v656_v49 = vsel %vm522_vm3, %v655_v58, %v651_v43 }
  0xeb   : > { %v670_v51 = vsel %vm669_vm10, %v656_v49, %v668_v50 }
  0xec   : > { %v671_v52 = vpack.c.b16 %v670_v51, %v670_v51 }
  0xee   : > { %1112 = vmatmul.mubr.msk.bf16.vlgmr.msra.gmra.mxu0 %vm752_vm11, %v671_v52  ;;  %1113 = vmatmul.mubr.msk.bf16.vlgmr.msra.gmra.mxu1 %vm752_vm11, %v671_v52 }
  0xef   : > { %851 = vmatpush1.bf16.msra.mxu0 %v1108_v22  ;;  %892 = vmatpush1.bf16.msra.mxu1 %v1110_v23  ;;  %v419_v22 = vsub.s32 2, %v1477_v45  ;;  %v416_v23 = vrot.slane %v407_v18, %v415_v19 }
  0xf0   : > { %852 = vmatprep.subr.bf16.mxu0 %v1101_v53  ;;  %893 = vmatprep.subr.bf16.mxu1 %v1103_v54 }
  0xf1   : > { %870 = vmatprep.mubr.bf16.mxu0 %v1277_v16  ;;  %911 = vmatprep.mubr.bf16.mxu1 %v1277_v16  ;;  %v423_v16 = vsub.s32 3, %v1477_v45  ;;  %v420_v0 = vrot.slane %v407_v18, %v419_v22 }
  0xf3   : > { %853 = vmatpush1.bf16.msra.mxu0 %v1100_v55  ;;  %894 = vmatpush1.bf16.msra.mxu1 %v1102_v56  ;;  %v424_v2 = vrot.slane %v407_v18, %v423_v16 }
  0xf6   : > { %1114 = vmatmul.mubr.msk.bf16.vlgmr.msra.gmra.mxu0 %vm752_vm11, %v671_v52  ;;  %1115 = vmatmul.mubr.msk.bf16.vlgmr.msra.gmra.mxu1 %vm752_vm11, %v671_v52 }
 0x1ae   : > { %v790_v59 = vpop.f32.mrf.mxu0  ;;  %v831_v60 = vpop.f32.mrf.mxu1 }
 0x1af   : > { %v791_v63 = vadd.f32 %v790_v59, %v412_v21  ;;  %v832_v7 = vadd.f32 %v831_v60, %v420_v0 }
 0x1b0   : > { %v792_v48 = vpop.f32.mrf.mxu0  ;;  %v833_v61 = vpop.f32.mrf.mxu1 }
 0x1b1   : > { %v793_v62 = vadd.f32 %v792_v48, %v416_v23  ;;  %920 = vmax.xlane.f32.xlu0 %v791_v63  ;;  %v834_v14 = vadd.f32 %v833_v61, %v424_v2 }
 0x1b2   : > { %v794_v5 = vpop.f32.mrf.mxu0  ;;  %v835_v6 = vpop.f32.mrf.mxu1 }
 0x1b3   : > { %930 = vmax.xlane.f32.xlu1 %v793_v62 }
 0x1b4   : > { %v795_v12 = vpop.f32.mrf.mxu0  ;;  %v836_v13 = vpop.f32.mrf.mxu1 }
 0x1b5   : > { %940 = vmax.xlane.f32.xlu0 %v832_v7 }
 0x1b6   : > { %v872_v25 = vpop.f32.mrf.mxu0  ;;  %v913_v26 = vpop.f32.mrf.mxu1 }
 0x1b7   : > { %v873_v27 = vadd.f32 %v872_v25, %v428_v10  ;;  %v914_v28 = vadd.f32 %v913_v26, %v436_v11  ;;  %950 = vmax.xlane.f32.xlu1 %v834_v14 }
 0x1b8   : > { %v874_v45 = vpop.f32.mrf.mxu0  ;;  %v915_v29 = vpop.f32.mrf.mxu1 }
 0x1b9   : > { %960 = vst [vmem:[%s1594_s9 + $0x20] sm:$0xff] %v873_v27  ;;  %962 = vst [vmem:[%s1594_s9 + $0x30] sm:$0xff] %v914_v28  ;;  %v875_v30 = vadd.f32 %v874_v45, %v432_v20  ;;  %v916_v31 = vadd.f32 %v915_v29, %v440_v24 }
 0x1ba   : > { %v876_v33 = vpop.f32.mrf.mxu0  ;;  %v917_v34 = vpop.f32.mrf.mxu1 }
 0x1bb   : > { %961 = vst [vmem:[%s1594_s9 + $0x28] sm:$0xff] %v875_v30  ;;  %963 = vst [vmem:[%s1599_s10] sm:$0xff] %v916_v31 }
 0x1bc   : > { %v877_v35 = vpop.f32.mrf.mxu0  ;;  %v918_v36 = vpop.f32.mrf.mxu1 }
 0x23a   : > { %v921_v38 = vpop.xlane.xlu0 %920 }
 0x23b   : > { %v922_v39 = vsub.f32 %v791_v63, %v921_v38 }
 0x23c   : > { %v931_v40 = vpop.xlane.xlu1 %930 }
 0x23d   : > { %v923_v41 = vmul.f32 1.442695, %v922_v39  ;;  %v932_v42 = vsub.f32 %v793_v62, %v931_v40 }
 0x23e   : > { %v941_v57 = vpop.xlane.xlu0 %940 }
 0x23f   : > { %1169 = vpow2.f32 %v923_v41  ;;  %v933_v58 = vmul.f32 1.442695, %v932_v42  ;;  %v942_v15 = vsub.f32 %v832_v7, %v941_v57 }
 0x240   : > { %v951_v32 = vpop.xlane.xlu1 %950 }
 0x241   : > { %1171 = vpow2.f32 %v933_v58  ;;  %v943_v37 = vmul.f32 1.442695, %v942_v15  ;;  %v952_v43 = vsub.f32 %v834_v14, %v951_v32 }
 0x243   : > { %1173 = vpow2.f32 %v943_v37  ;;  %v953_v44 = vmul.f32 1.442695, %v952_v43 }
 0x245   : > { %1175 = vpow2.f32 %v953_v44 }
 0x24c   : > { %v1170_v46 = vpop.eup %1169 }
 0x24d   : > { %925 = vadd.xlane.f32.xlu0 %v1170_v46 }
 0x24e   : > { %v1172_v8 = vpop.eup %1171 }
 0x24f   : > { %935 = vadd.xlane.f32.xlu1 %v1172_v8 }
 0x250   : > { %v1174_v9 = vpop.eup %1173 }
 0x251   : > { %945 = vadd.xlane.f32.xlu0 %v1174_v9 }
 0x252   : > { %v1176_v49 = vpop.eup %1175 }
 0x253   : > { %955 = vadd.xlane.f32.xlu1 %v1176_v49 }
 0x254   : > { %1198 = shalt.err (!%p1195_p3)
}
 0x255   : > { %s1199_s30 = scalar_lea.hbm %s995_s14, 128  ;;  %s1203_s8 = scalar_lea.hbm %s1663_s4, 256 }
 0x256   : > { %p1200_p4 = scmp.ne.s32.totalorder %s995_s14, %s1199_s30  ;;  %p1204_p9 = scmp.lt.s32.totalorder %s995_s14, %s1663_s4 }
 0x257   : > { %p1205_p10 = scmp.lt.s32.totalorder %s1203_s8, %s1199_s30 }
 0x258   : > { %p1201_p7 = pnand %p1200_p4, %p1343_p5 }
 0x259   : > { %p1206_p11 = por %p1205_p10, %p1204_p9 }
 0x25a   : > { %p1202_p8 = pneg %p1201_p7 }
 0x25c   : > { %p1207_p12 = pnand %p1206_p11, %p1202_p8 }
 0x25e   : > { %1210 = shalt.err (!%p1207_p12)
}
 0x25f   : > { %1125 = dma.vmem_to_hbm [thread:$0]  (%p1343_p5), %s998_s20, 128, %s995_s14, %s970_s22  }
 0x260   : > { %s1123_s12 = smul.u32 896, %s1326_s19  ;;  %s984_s13 = sshll.u32 %s1594_s9, 4  ;;  %s985_s13 = int_to_ptr.vmem [resolvable:$true] %s984_s13 }
 0x261   : > { %s965_s23 = scalar_lea.sflag [#allocation3], %s1586_s6  ;;  %s1211_s27 = scalar_lea.vmem %s985_s13, 896 }
 0x262   : > { %s982_s22 = scalar_lea.hbm %s1662_s3, %s1123_s12  ;;  %p1212_p13 = scmp.ne.s32.totalorder %s985_s13, %s1211_s27 }
 0x263   : > { %s1279_s19 = smov [#allocation2]  }
 0x264   : > { %p1213_p0 = pnand %p1212_p13, %p1343_p5  ;;  %s1215_s28 = sshll.u32 %s1279_s19, 4  ;;  %s1216_s28 = int_to_ptr.vmem [resolvable:$false] %s1215_s28 }
 0x265   : > { %s1217_s29 = scalar_lea.vmem %s1216_s28, 1792  ;;  %p1218_p2 = scmp.lt.s32.totalorder %s985_s13, %s1216_s28 }
 0x266   : > { %p1214_p1 = pneg %p1213_p0  ;;  %p1219_p3 = scmp.lt.s32.totalorder %s1217_s29, %s1211_s27 }
 0x268   : > { %p1220_p4 = por %p1219_p3, %p1218_p2 }
 0x26a   : > { %p1221_p7 = pnand %p1220_p4, %p1214_p1 }
 0x2d6   : > { %v926_v50 = vpop.xlane.xlu0 %925 }
 0x2d7   : > { %1177 = vrcp.f32 %v926_v50 }
 0x2d8   : > { %v936_v51 = vpop.xlane.xlu1 %935 }
 0x2d9   : > { %1179 = vrcp.f32 %v936_v51 }
 0x2da   : > { %v946_v52 = vpop.xlane.xlu0 %945 }
 0x2db   : > { %1181 = vrcp.f32 %v946_v52 }
 0x2dc   : > { %v956_v53 = vpop.xlane.xlu1 %955 }
 0x2dd   : > { %1183 = vrcp.f32 %v956_v53 }
 0x2e4   : > { %v1178_v54 = vpop.eup %1177 }
 0x2e5   : > { %v928_v55 = vmul.f32 %v1178_v54, %v1170_v46 }
 0x2e6   : > { %v1180_v56 = vpop.eup %1179 }
 0x2e7   : > { %929 = vst [vmem:[%s1594_s9] sm:$0xff] %v928_v55  ;;  %v938_v17 = vmul.f32 %v1180_v56, %v1172_v8 }
 0x2e8   : > { %v1182_v18 = vpop.eup %1181 }
 0x2e9   : > { %939 = vst [vmem:[%s1594_s9 + $0x8] sm:$0xff] %v938_v17  ;;  %v948_v19 = vmul.f32 %v1182_v18, %v1174_v9 }
 0x2ea   : > { %v1184_v21 = vpop.eup %1183 }
 0x2eb   : > { %949 = vst [vmem:[%s1594_s9 + $0x10] sm:$0xff] %v948_v19  ;;  %v958_v22 = vmul.f32 %v1184_v21, %v1176_v49 }
 0x2ed   : > { %959 = vst [vmem:[%s1594_s9 + $0x18] sm:$0xff] %v958_v22 }
 0x2ee   : > { %1224 = shalt.err (!%p1221_p7)
}
 0x2ef   : > { %s1225_s30 = scalar_lea.hbm %s982_s22, 896  ;;  %s1229_s5 = scalar_lea.hbm %s1662_s3, 1792 }
 0x2f0   : > { %p1226_p8 = scmp.ne.s32.totalorder %s982_s22, %s1225_s30  ;;  %p1230_p11 = scmp.lt.s32.totalorder %s982_s22, %s1662_s3 }
 0x2f1   : > { %p1231_p12 = scmp.lt.s32.totalorder %s1229_s5, %s1225_s30 }
 0x2f2   : > { %p1227_p9 = pnand %p1226_p8, %p1343_p5 }
 0x2f3   : > { %p1232_p13 = por %p1231_p12, %p1230_p11 }
 0x2f4   : > { %p1228_p10 = pneg %p1227_p9 }
 0x2f6   : > { %p1233_p0 = pnand %p1232_p13, %p1228_p10 }
 0x2f8   : > { %1236 = shalt.err (!%p1233_p0)
}
 0x2f9   : > { %1124 = dma.vmem_to_hbm [thread:$0]  (%p1343_p5), %s985_s13, 896, %s982_s22, %s965_s23  }
 0x2fa PF: > { %p1135_p1 = scmp.ge.s32.totalorder %s1275_s18, 2  ;;  %s1009_s10 = sand.u32 1, %s1263_s15  }
 0x2fb   : > { %s1010_s11 = scalar_lea.sflag [#allocation3], %s1009_s10 }
 0x2fc   : > { %p1129_p2 = pnand %p1135_p1, %p1347_p6 }
 0x2fe   : > { %p1130_p3 = pneg %p1129_p2 }
 0x300   : > { %1254 = dma.done.wait (%p1130_p3), %s1010_s11, 896  }
 0x301   : > { %1256 = vsyncadd (%p1130_p3), %s1010_s11, 4294966400  ;;  %s1019_s12 = scalar_lea.sflag [#allocation5], %s1009_s10 }
 0x302   : > { %1258 = dma.done.wait (%p1130_p3), %s1019_s12, 128  }
 0x303   : > { %1260 = vsyncadd (%p1130_p3), %s1019_s12, 4294967168  ;;  %p18_p5 = scmp.ge.s32.totalorder %s1330_s21, 4   ;;  %s1666_s15 = smov %s1267_s16 }
 0x304   : > { %s1667_s16 = smov %s1271_s17  ;;  %s1668_s17 = smov %s1341_s24 }
 0x305   : > { %s1669_s18 = smov %s1330_s21  ;;  %20 = sbr.rel (!%p18_p5) target bundleno = 5 (0x5), region = 84 }
 0x30a   :  { %1024 = vsyncpa [#allocation3], 1 }
 0x30b   :  { %1026 = vsyncpa [#allocation3 + $0x1], 1 }
 0x30c   :  { %1027 = vsyncpa [#allocation5], 1 }
 0x30d   :  { %1029 = vsyncpa [#allocation5 + $0x1], 1 }

</bundles_post_ra>
